<compile_context>
chip_gen: v7x
topology: tpu7x:2x2x1
jax: 0.10.0
libtpu: 0.0.40
codegen_flags: <defaults>
</compile_context>

<pallas_src>
import math
import functools
import jax
import jax.numpy as jnp
from jax import lax
from jax.experimental import pallas as pl
from jax.experimental.pallas import tpu as pltpu

# ----------------------------------------------------------------------------
# Configuration (mirrors the module-level script constants, made deterministic)
# ----------------------------------------------------------------------------
KERNEL_SIZE = 513
SAMPLE_RATE = 16000
LOW_FREQ = 50            # TODO(synk): argparse-driven in the original script.
HIGH_FREQ = 7000
PADDING = KERNEL_SIZE // 2

# TODO(synk): compute_coeff(low_freq, high_freq) is not defined in the provided
# source; use a deterministic placeholder normalization coefficient of 1.0.
NORMALIZATION_COEFF = 1.0

CHUNK = 256    # time samples per chunk row (lane axis; MXU N=K).  v5e: 128.
LCI_MAX = 512  # max chunk rows per block (sublane axis; MXU M).  512-1024 ok.
HALO = 16      # halo rows fetched past each block (>= SB-1, multiple of 16)


# ----------------------------------------------------------------------------
# Filter construction (matches SincConv_fast.forward filter math)
# ----------------------------------------------------------------------------
def build_sinc_filter(kernel_size, low_hz, high_hz, sample_rate, norm_coeff):
    k = kernel_size if kernel_size % 2 == 1 else kernel_size + 1

    # window_ = 0.42 - 0.5*cos(2*pi*n_lin/K) + 0.08*cos(4*pi*n_lin/K)
    n_lin = jnp.linspace(0.0, k / 2 - 1, int(k / 2), dtype=jnp.float32)
    window = (0.42
              - 0.5 * jnp.cos(2 * math.pi * n_lin / k)
              + 0.08 * jnp.cos(4 * math.pi * n_lin / k))

    n_half = (k - 1) / 2.0
    n_ = (2 * math.pi * jnp.arange(-n_half, 0, dtype=jnp.float32)
          / sample_rate).reshape(1, -1)                        # (1, (K-1)/2)

    low = jnp.array([[low_hz]], dtype=jnp.float32)             # (1, 1)
    band_hz = jnp.array([[high_hz - low_hz]], dtype=jnp.float32)
    high = jnp.clip(low + jnp.abs(band_hz), 0.0, sample_rate / 2)
    band = (high - low)[:, 0]                                  # (1,)

    f_t_low = low @ n_                                         # (1, (K-1)/2)
    f_t_high = high @ n_

    band_pass_left = ((jnp.sin(f_t_high) - jnp.sin(f_t_low)) / (n_ / 2)) * window
    band_pass_center = 2 * band.reshape(-1, 1)                 # (1, 1)
    band_pass_right = jnp.flip(band_pass_left, axis=1)

    band_pass = jnp.concatenate(
        [band_pass_left, band_pass_center, band_pass_right], axis=1)   # (1, K)
    band_pass = band_pass / (2 * band[:, None] * norm_coeff)

    return band_pass.reshape(1, 1, k).astype(jnp.float32)      # (1, 1, K)


# ----------------------------------------------------------------------------
# Pallas kernel: block-Toeplitz sum of SB chunk x chunk matmuls per block
# ----------------------------------------------------------------------------
def _sinc_block_toeplitz_kernel(wt_ref, xa_ref, xh_ref, o_ref, *, sb_count, lci):
    # wt_ref : (SB, CHUNK, CHUNK) bf16 Toeplitz blocks; constant index_map, so
    #          it is DMA'd once and stays resident across the whole grid.
    # xa_ref : (1, LCI, CHUNK)    bf16 chunk rows ci in [cb*LCI, (cb+1)*LCI)
    # xh_ref : (1, HALO, CHUNK)   bf16 halo rows     [(cb+1)*LCI, +HALO)
    # o_ref  : (1, LCI, CHUNK)    f32 output, (chunk_index, time) order,
    #                             written exactly once (no RMW accumulation).
    xa = xa_ref[0]
    xh = xh_ref[0]
    chunk = xa.shape[-1]

    # Aligned concat (both row counts are multiples of 16), then do the
    # per-sb row shifts on an f32 copy (plain 32-bit sublane relayout; the
    # values round-trip bf16 -> f32 -> bf16 exactly, so the MXU still sees
    # single-pass bf16 operands).
    xfull = jnp.concatenate([xa, xh], axis=0).astype(jnp.float32)

    acc = jnp.zeros((lci, chunk), jnp.float32)
    for sb in range(sb_count):                       # static unroll (SB = 3)
        xs = xfull[sb:sb + lci].astype(jnp.bfloat16)           # (LCI, CHUNK)
        acc = acc + jnp.dot(xs, wt_ref[sb],
                            preferred_element_type=jnp.float32)
    o_ref[0] = acc


def sinc_conv1d(waveforms, filt, padding, *, chunk=CHUNK, lci_max=LCI_MAX):
    """waveforms: (B, 1, N) f32; filt: (1, 1, K) f32 -> (B, 1, N) f32."""
    b, c, n = waveforms.shape
    assert c == 1, "SincConv only supports one input channel"
    k = filt.shape[-1]
    w = filt.reshape(k).astype(jnp.float32)

    nc = pl.cdiv(n, chunk)                         # real output chunk-rows
    sb_count = (chunk + k - 2) // chunk + 1        # Toeplitz blocks (3 here)
    assert sb_count - 1 <= HALO

    # Rows per block: big for bandwidth, but never much larger than the real
    # workload (keeps small inputs from padding the grid away).
    lci = min(lci_max, pl.cdiv(nc, HALO) * HALO)
    num_cb = pl.cdiv(nc, lci)
    nc_pad = num_cb * lci
    m_rows = nc_pad + HALO                         # + halo rows for last block

    # Zero-padded signal as NON-overlapping bf16 chunk rows (1x footprint).
    x = waveforms[:, 0, :].astype(jnp.float32)
    xpad = jnp.pad(x, ((0, 0), (padding, m_rows * chunk - padding - n)))
    xrows = xpad.reshape(b, m_rows, chunk).astype(jnp.bfloat16)

    # Block-Toeplitz filter blocks: WT[sb, ss, tt] = w[sb*chunk + ss - tt]
    ss = jnp.arange(chunk)[:, None]
    tt = jnp.arange(chunk)[None, :]
    blocks = []
    for sb in range(sb_count):
        j = sb * chunk + ss - tt
        blocks.append(jnp.where((j >= 0) & (j < k), w[jnp.clip(j, 0, k - 1)], 0.0))
    wt = jnp.stack(blocks, axis=0).astype(jnp.bfloat16)   # (SB, CHUNK, CHUNK)

    kernel = functools.partial(_sinc_block_toeplitz_kernel,
                               sb_count=sb_count, lci=lci)

    flops = 2 * sb_count * b * nc_pad * chunk * chunk
    bytes_accessed = (b * m_rows * chunk * 2            # xrows (bf16, ~1x)
                      + sb_count * chunk * chunk * 2    # resident filter blocks
                      + b * nc_pad * chunk * 4)         # f32 output

    out_rows = pl.pallas_call(
        kernel,
        out_shape=jax.ShapeDtypeStruct((b, nc_pad, chunk), jnp.float32),
        grid=(b, num_cb),
        in_specs=[
            # Filter blocks: constant index -> fetched once, stays in VMEM.
            pl.BlockSpec((sb_count, chunk, chunk), lambda bi, cb: (0, 0, 0)),
            # Main chunk rows of this block (streamed, double-buffered).
            pl.BlockSpec((1, lci, chunk), lambda bi, cb: (bi, cb, 0)),
            # Tiny halo: the HALO rows right after this block (same array).
            pl.BlockSpec((1, HALO, chunk),
                         lambda bi, cb: (bi, (cb + 1) * (lci // HALO), 0)),
        ],
        out_specs=pl.BlockSpec((1, lci, chunk), lambda bi, cb: (bi, cb, 0)),
        compiler_params=pltpu.CompilerParams(
            dimension_semantics=("parallel", "parallel")),   # megacore-friendly
        cost_estimate=pl.CostEstimate(flops=flops, transcendentals=0,
                                      bytes_accessed=bytes_accessed),
    )(wt, xrows, xrows)

    # Output is already (batch, chunk_index, time): un-chunking is a reshape.
    out = out_rows.reshape(b, nc_pad * chunk)[:, :n]
    return out[:, None, :]                                   # (B, 1, N)


# ----------------------------------------------------------------------------
# Reference (pure JAX) for validation
# ----------------------------------------------------------------------------
def sinc_conv1d_ref(waveforms, filt, padding):
    return lax.conv_general_dilated(
        waveforms, filt,
        window_strides=(1,),
        padding=[(padding, padding)],
        dimension_numbers=("NCH", "OIH", "NCH"),
        precision=lax.Precision.HIGHEST,
    )


if __name__ == "__main__":
    key = jax.random.PRNGKey(0)
    batch, n_samples = 2, 1024                                  # (B, 1, N)
    waveforms = jax.random.normal(key, (batch, 1, n_samples), dtype=jnp.float32)

    filt = build_sinc_filter(KERNEL_SIZE, LOW_FREQ, HIGH_FREQ,
                             SAMPLE_RATE, NORMALIZATION_COEFF)

    fwd = jax.jit(lambda wf: sinc_conv1d(wf, filt, PADDING))
    out = jax.block_until_ready(fwd(waveforms))
    assert out.shape == (batch, 1, n_samples), out.shape

    # Tight check against a reference that sees the same bf16 operand
    # quantization as the MXU (products are exact in f32, only accumulation
    # order differs).
    wf_q = waveforms.astype(jnp.bfloat16).astype(jnp.float32)
    filt_q = filt.astype(jnp.bfloat16).astype(jnp.float32)
    ref_q = jax.block_until_ready(sinc_conv1d_ref(wf_q, filt_q, PADDING))
    err_q = float(jnp.max(jnp.abs(out - ref_q)))
    assert jnp.allclose(out, ref_q, rtol=1e-3, atol=1e-3), err_q

    # Loose end-to-end check against the full-f32 reference; the difference is
    # bounded by bf16 operand rounding across the 513-tap reduction.
    ref = jax.block_until_ready(sinc_conv1d_ref(waveforms, filt, PADDING))
    err = float(jnp.max(jnp.abs(out - ref)))
    assert jnp.allclose(out, ref, rtol=5e-2, atol=5e-2), err

    print("KERNEL_OK")
</pallas_src>

<mosaic_0001>
module attributes {stable_mosaic.version = 11 : i64} {
  func.func @_sinc_block_toeplitz_kernel(%arg0: i32, %arg1: i32, %arg2: memref<3x256x256xbf16, #tpu.memory_space<vmem>>, %arg3: memref<1x16x256xbf16, #tpu.memory_space<vmem>>, %arg4: memref<1x16x256xbf16, #tpu.memory_space<vmem>>, %arg5: memref<1x16x256xf32, #tpu.memory_space<vmem>>) attributes {dimension_semantics = [#tpu.dimension_semantics<parallel>, #tpu.dimension_semantics<parallel>], iteration_bounds = array<i64: 2, 1>, scalar_prefetch = 0 : i64, scratch_operands = 0 : i64, tpu.core_type = #tpu.core_type<tc>, window_params = [{pipeline_mode = #tpu.pipeline_mode<synchronous>, transform_indices = @transform_0, window_bounds = array<i64: 3, 256, 256>}, {transform_indices = @transform_1, window_bounds = array<i64: 1, 16, 256>}, {transform_indices = @transform_2, window_bounds = array<i64: 1, 16, 256>}, {transform_indices = @transform_3, window_bounds = array<i64: 1, 16, 256>}]} {
    %c0 = arith.constant 0 : index
    %c0_0 = arith.constant 0 : index
    %c0_1 = arith.constant 0 : index
    %0 = vector.load %arg3[%c0, %c0_0, %c0_1] : memref<1x16x256xbf16, #tpu.memory_space<vmem>>, vector<1x16x256xbf16>
    %1 = vector.shape_cast %0 : vector<1x16x256xbf16> to vector<16x256xbf16>
    %c0_2 = arith.constant 0 : index
    %c0_3 = arith.constant 0 : index
    %c0_4 = arith.constant 0 : index
    %2 = vector.load %arg4[%c0_2, %c0_3, %c0_4] : memref<1x16x256xbf16, #tpu.memory_space<vmem>>, vector<1x16x256xbf16>
    %3 = vector.shape_cast %2 : vector<1x16x256xbf16> to vector<16x256xbf16>
    %4 = tpu.concatenate %1, %3 in 0 : vector<16x256xbf16>, vector<16x256xbf16> -> vector<32x256xbf16>
    %5 = arith.extf %4 : vector<32x256xbf16> to vector<32x256xf32>
    %cst = arith.constant 0.000000e+00 : f32
    %6 = vector.broadcast %cst : f32 to vector<16x256xf32>
    %7 = vector.extract_strided_slice %5 {offsets = [0, 0], sizes = [16, 256], strides = [1, 1]} : vector<32x256xf32> to vector<16x256xf32>
    %8 = arith.truncf %7 : vector<16x256xf32> to vector<16x256xbf16>
    %c0_5 = arith.constant 0 : index
    %c0_6 = arith.constant 0 : index
    %c0_7 = arith.constant 0 : index
    %9 = vector.load %arg2[%c0_5, %c0_6, %c0_7] : memref<3x256x256xbf16, #tpu.memory_space<vmem>>, vector<1x256x256xbf16>
    %10 = vector.shape_cast %9 : vector<1x256x256xbf16> to vector<256x256xbf16>
    %cst_8 = arith.constant dense<0.000000e+00> : vector<16x256xf32>
    %11 = tpu.matmul %8, %10, %cst_8 {dimension_numbers = #tpu.dot_dimension_numbers<[1], [0], [0], [1], [0, 0, 1, 1], [], []>} : vector<16x256xbf16>, vector<256x256xbf16>, vector<16x256xf32> -> vector<16x256xf32>
    %12 = arith.addf %6, %11 : vector<16x256xf32>
    %13 = vector.extract_strided_slice %5 {offsets = [1, 0], sizes = [16, 256], strides = [1, 1]} : vector<32x256xf32> to vector<16x256xf32>
    %14 = arith.truncf %13 : vector<16x256xf32> to vector<16x256xbf16>
    %c1 = arith.constant 1 : index
    %c0_9 = arith.constant 0 : index
    %c0_10 = arith.constant 0 : index
    %15 = vector.load %arg2[%c1, %c0_9, %c0_10] : memref<3x256x256xbf16, #tpu.memory_space<vmem>>, vector<1x256x256xbf16>
    %16 = vector.shape_cast %15 : vector<1x256x256xbf16> to vector<256x256xbf16>
    %cst_11 = arith.constant dense<0.000000e+00> : vector<16x256xf32>
    %17 = tpu.matmul %14, %16, %cst_11 {dimension_numbers = #tpu.dot_dimension_numbers<[1], [0], [0], [1], [0, 0, 1, 1], [], []>} : vector<16x256xbf16>, vector<256x256xbf16>, vector<16x256xf32> -> vector<16x256xf32>
    %18 = arith.addf %12, %17 : vector<16x256xf32>
    %19 = vector.extract_strided_slice %5 {offsets = [2, 0], sizes = [16, 256], strides = [1, 1]} : vector<32x256xf32> to vector<16x256xf32>
    %20 = arith.truncf %19 : vector<16x256xf32> to vector<16x256xbf16>
    %c2 = arith.constant 2 : index
    %c0_12 = arith.constant 0 : index
    %c0_13 = arith.constant 0 : index
    %21 = vector.load %arg2[%c2, %c0_12, %c0_13] : memref<3x256x256xbf16, #tpu.memory_space<vmem>>, vector<1x256x256xbf16>
    %22 = vector.shape_cast %21 : vector<1x256x256xbf16> to vector<256x256xbf16>
    %cst_14 = arith.constant dense<0.000000e+00> : vector<16x256xf32>
    %23 = tpu.matmul %20, %22, %cst_14 {dimension_numbers = #tpu.dot_dimension_numbers<[1], [0], [0], [1], [0, 0, 1, 1], [], []>} : vector<16x256xbf16>, vector<256x256xbf16>, vector<16x256xf32> -> vector<16x256xf32>
    %24 = arith.addf %18, %23 : vector<16x256xf32>
    %c0_15 = arith.constant 0 : index
    %c0_16 = arith.constant 0 : index
    %c0_17 = arith.constant 0 : index
    %25 = vector.load %arg5[%c0_15, %c0_16, %c0_17] : memref<1x16x256xf32, #tpu.memory_space<vmem>>, vector<1x16x256xf32>
    %26 = vector.shape_cast %25 : vector<1x16x256xf32> to vector<16x256xf32>
    %27 = vector.shape_cast %24 : vector<16x256xf32> to vector<1x16x256xf32>
    tpu.vector_store %arg5[%c0_15, %c0_16, %c0_17], %27 {strides = array<i32>} : memref<1x16x256xf32, #tpu.memory_space<vmem>>, vector<1x16x256xf32>,
    return
  }
  func.func @transform_0(%arg0: i32, %arg1: i32) -> (i32, i32, i32) {
    %c0_i32 = arith.constant 0 : i32
    %c0_i32_0 = arith.constant 0 : i32
    %c0_i32_1 = arith.constant 0 : i32
    %c0_i32_2 = arith.constant 0 : i32
    return %c0_i32, %c0_i32_0, %c0_i32_1 : i32, i32, i32
  }
  func.func @transform_1(%arg0: i32, %arg1: i32) -> (i32, i32, i32) {
    %c0_i32 = arith.constant 0 : i32
    %c0_i32_0 = arith.constant 0 : i32
    return %arg0, %arg1, %c0_i32 : i32, i32, i32
  }
  func.func @transform_2(%arg0: i32, %arg1: i32) -> (i32, i32, i32) {
    %c1_i32 = arith.constant 1 : i32
    %0 = arith.addi %arg1, %c1_i32 : i32
    %c1_i32_0 = arith.constant 1 : i32
    %1 = arith.muli %0, %c1_i32_0 : i32
    %c0_i32 = arith.constant 0 : i32
    %c0_i32_1 = arith.constant 0 : i32
    return %arg0, %1, %c0_i32 : i32, i32, i32
  }
  func.func @transform_3(%arg0: i32, %arg1: i32) -> (i32, i32, i32) {
    %c0_i32 = arith.constant 0 : i32
    %c0_i32_0 = arith.constant 0 : i32
    return %arg0, %arg1, %c0_i32 : i32, i32, i32
  }
}

</mosaic_0001>

<bundles_post_ra>
// kernel: _lambda_.1
= control target key start
LH: loop header
LB: loop body
LE: loop exit
PB: predicated region body
PF: predicated region fallthrough
CT: control target
= control target key end

     0   :  { %s1578_s12 = smov 0   ;;  %s1580_s13 = smov 0   ;;  %s1931_s0 = inlined_call_operand.vmem [shape: bf16[3,256,256], index: 0, kind: input, shape index: {}]   ;;  %s1932_s1 = inlined_call_operand.vmem [shape: bf16[2,32,256], index: 1, kind: input, shape index: {}, may-alias: {1,2}]   ;;  %s1933_s2 = inlined_call_operand.vmem [shape: bf16[2,32,256], index: 2, kind: input, shape index: {}, may-alias: {1,2}]   ;;  %s1934_s3 = inlined_call_operand.vmem [shape: f32[2,16,256], index: 3, kind: output, shape index: {}]  }
   0x1   :  { %s1582_s14 = smov 0  }
   0x2 LB: > { %s25_s15 = sadd.s32 1, %s1552_s13  ;;  %p1171_p0 = scmp.ge.s32.totalorder %s1556_s14, 1  ;;  %s1556_s14 = sphi %s1582_s14, %s13_s14   ;;  %s1552_s13 = sphi %s1580_s13, %s1936_s13   ;;  %s1548_s12 = sphi %s1578_s12, %s1935_s12  }
   0x3   : > { %p27_p1 = scmp.ge.s32.totalorder %s25_s15, 2  ;;  %p181_p2 = scmp.lt.s32.totalorder %s1556_s14, 3 }
   0x5   : > { %s1938_s15 = smov (%p27_p1, %s25_s15), 0  ;;  %p182_p3 = pnand %p1171_p0, %p181_p2 }
   0x6   : > { %v1385_v0 = vld [vmem:[%s1931_s0 + $0x4] ss:$8 sps:$4 sm:$0xff] (!%p182_p3)   ;;  %v1387_v1 = vld [vmem:[%s1931_s0] ss:$8 sps:$4 sm:$0xff] (!%p182_p3)   ;;  %v1388_v2 = vld [vmem:[%s1931_s0 + $0x14] ss:$8 sps:$4 sm:$0xff] (!%p182_p3)  }
   0x7   : > { %185 = sbr.rel (%p182_p3) target bundleno = 353 (0x161), region = 32  ;;  %750 = vmatprep.subr.bf16.mxu0 (!%p182_p3), %v1385_v0  ;;  %v1390_v3 = vld [vmem:[%s1931_s0 + $0x10] ss:$8 sps:$4 sm:$0xff] (!%p182_p3)   ;;  %v1391_v4 = vld [vmem:[%s1931_s0 + $0x24] ss:$8 sps:$4 sm:$0xff] (!%p182_p3)   ;;  %p227_p4 = scmp.lt.s32.totalorder (!%p182_p3), %s1548_s12, 1 }
   0x8   : > { %751 = vmatpush1.bf16.msra.mxu0 (!%p182_p3), %v1387_v1  ;;  %v1393_v5 = vld [vmem:[%s1931_s0 + $0x20] ss:$8 sps:$4 sm:$0xff] (!%p182_p3)   ;;  %v1394_v6 = vld [vmem:[%s1931_s0 + $0x34] ss:$8 sps:$4 sm:$0xff] (!%p182_p3)   ;;  %v1396_v7 = vld [vmem:[%s1931_s0 + $0x30] ss:$8 sps:$4 sm:$0xff] (!%p182_p3)  }
   0x9   : > { %752 = vmatprep.subr.bf16.mxu0 (!%p182_p3), %v1388_v2  ;;  %v1397_v8 = vld [vmem:[%s1931_s0 + $0x44] ss:$8 sps:$4 sm:$0xff] (!%p182_p3)   ;;  %v1399_v9 = vld [vmem:[%s1931_s0 + $0x40] ss:$8 sps:$4 sm:$0xff] (!%p182_p3)   ;;  %v1400_v10 = vld [vmem:[%s1931_s0 + $0x54] ss:$8 sps:$4 sm:$0xff] (!%p182_p3)  }
   0xa   : > { %v1402_v11 = vld [vmem:[%s1931_s0 + $0x50] ss:$8 sps:$4 sm:$0xff] (!%p182_p3)   ;;  %v1403_v12 = vld [vmem:[%s1931_s0 + $0x64] ss:$8 sps:$4 sm:$0xff] (!%p182_p3)   ;;  %v1405_v14 = vld [vmem:[%s1931_s0 + $0x60] ss:$8 sps:$4 sm:$0xff] (!%p182_p3)  }
   0xb   : > { %v1432_v13 = vld [vmem:[%s1931_s0 + $0x104] ss:$8 sps:$4 sm:$0xff] (!%p182_p3)   ;;  %v1435_v15 = vld [vmem:[%s1931_s0 + $0x100] ss:$8 sps:$4 sm:$0xff] (!%p182_p3)   ;;  %v1406_v17 = vld [vmem:[%s1931_s0 + $0x74] ss:$8 sps:$4 sm:$0xff] (!%p182_p3)  }
   0xc   : > { %753 = vmatpush1.bf16.msra.mxu0 (!%p182_p3), %v1390_v3  ;;  %547 = vmatprep.subr.bf16.mxu1 (!%p182_p3), %v1432_v13  ;;  %v1441_v18 = vld [vmem:[%s1931_s0 + $0x114] ss:$8 sps:$4 sm:$0xff] (!%p182_p3)   ;;  %v1444_v19 = vld [vmem:[%s1931_s0 + $0x110] ss:$8 sps:$4 sm:$0xff] (!%p182_p3)   ;;  %v1409_v21 = vld [vmem:[%s1931_s0 + $0x84] ss:$8 sps:$4 sm:$0xff] (!%p182_p3)  }
   0xd   : > { %754 = vmatprep.subr.bf16.mxu0 (!%p182_p3), %v1391_v4  ;;  %548 = vmatpush1.bf16.msra.mxu1 (!%p182_p3), %v1435_v15  ;;  %v1408_v20 = vld [vmem:[%s1931_s0 + $0x70] ss:$8 sps:$4 sm:$0xff] (!%p182_p3)   ;;  %v1448_v22 = vld [vmem:[%s1931_s0 + $0x124] ss:$8 sps:$4 sm:$0xff] (!%p182_p3)   ;;  %v1450_v23 = vld [vmem:[%s1931_s0 + $0x120] ss:$8 sps:$4 sm:$0xff] (!%p182_p3)  }
   0xe   : > { %s1940_s12 = smov (!%p227_p4, %s1548_s12), 1  ;;  %549 = vmatprep.subr.bf16.mxu1 %v1441_v18  ;;  %v1411_v24 = vld [vmem:[%s1931_s0 + $0x80] ss:$8 sps:$4 sm:$0xff]   ;;  %v1412_v25 = vld [vmem:[%s1931_s0 + $0x94] ss:$8 sps:$4 sm:$0xff]   ;;  %vm830_vm0 = vcmask 1046528  }
   0xf   : > { %s1629_s11 = sshll.u32 %s1940_s12, 5  ;;  %v1454_v26 = vld [vmem:[%s1931_s0 + $0x134] ss:$8 sps:$4 sm:$0xff]   ;;  %v1456_v27 = vld [vmem:[%s1931_s0 + $0x130] ss:$8 sps:$4 sm:$0xff]  }
  0x10   : > { %755 = vmatpush1.bf16.msra.mxu0 %v1393_v5  ;;  %s1641_s22 = scalar_lea.vmem %s1932_s1, %s1629_s11  ;;  %v1460_v28 = vld [vmem:[%s1931_s0 + $0x144] ss:$8 sps:$4 sm:$0xff]   ;;  %v1414_v29 = vld [vmem:[%s1931_s0 + $0x90] ss:$8 sps:$4 sm:$0xff]   ;;  %v1462_v31 = vld [vmem:[%s1931_s0 + $0x140] ss:$8 sps:$4 sm:$0xff]   ;;  %s259_s9 = scalar_lea.vmem %s1934_s3, %s1629_s11 }
  0x11   : > { %756 = vmatprep.subr.bf16.mxu0 %v1394_v6  ;;  %v1653_v16 = vld [vmem:[%s1641_s22 + $0x4] ss:$8 sps:$4 sm:$0xff]   ;;  %550 = vmatpush1.bf16.msra.mxu1 %v1444_v19  ;;  %v1466_v32 = vld [vmem:[%s1931_s0 + $0x154] ss:$8 sps:$4 sm:$0xff]   ;;  %v1417_v33 = vld [vmem:[%s1931_s0 + $0xa0] ss:$8 sps:$4 sm:$0xff]  }
  0x12   : > { %782 = vmatprep.mubr.bf16.mxu0 %v1653_v16  ;;  %551 = vmatprep.subr.bf16.mxu1 %v1448_v22  ;;  %v1415_v30 = vld [vmem:[%s1931_s0 + $0xa4] ss:$8 sps:$4 sm:$0xff]   ;;  %v1418_v34 = vld [vmem:[%s1931_s0 + $0xb4] ss:$8 sps:$4 sm:$0xff]   ;;  %v1468_v35 = vld [vmem:[%s1931_s0 + $0x150] ss:$8 sps:$4 sm:$0xff]  }
  0x13   : > { %v1472_v36 = vld [vmem:[%s1931_s0 + $0x164] ss:$8 sps:$4 sm:$0xff]   ;;  %v1420_v37 = vld [vmem:[%s1931_s0 + $0xb0] ss:$8 sps:$4 sm:$0xff]   ;;  %v1474_v39 = vld [vmem:[%s1931_s0 + $0x160] ss:$8 sps:$4 sm:$0xff]  }
  0x14   : > { %757 = vmatpush1.bf16.msra.mxu0 %v1396_v7  ;;  %v1421_v38 = vld [vmem:[%s1931_s0 + $0xc4] ss:$8 sps:$4 sm:$0xff]   ;;  %v1478_v40 = vld [vmem:[%s1931_s0 + $0x174] ss:$8 sps:$4 sm:$0xff]   ;;  %v1423_v41 = vld [vmem:[%s1931_s0 + $0xc0] ss:$8 sps:$4 sm:$0xff]  }
  0x15   : > { %758 = vmatprep.subr.bf16.mxu0 %v1397_v8  ;;  %552 = vmatpush1.bf16.msra.mxu1 %v1450_v23  ;;  %v1424_v42 = vld [vmem:[%s1931_s0 + $0xd4] ss:$8 sps:$4 sm:$0xff]   ;;  %v1480_v43 = vld [vmem:[%s1931_s0 + $0x170] ss:$8 sps:$4 sm:$0xff]   ;;  %v1484_v44 = vld [vmem:[%s1931_s0 + $0x184] ss:$8 sps:$4 sm:$0xff]  }
  0x16   : > { %553 = vmatprep.subr.bf16.mxu1 %v1454_v26  ;;  %v1426_v45 = vld [vmem:[%s1931_s0 + $0xd0] ss:$8 sps:$4 sm:$0xff]   ;;  %v1427_v46 = vld [vmem:[%s1931_s0 + $0xe4] ss:$8 sps:$4 sm:$0xff]   ;;  %v1486_v47 = vld [vmem:[%s1931_s0 + $0x180] ss:$8 sps:$4 sm:$0xff]  }
  0x17   : > { %v1490_v48 = vld [vmem:[%s1931_s0 + $0x194] ss:$8 sps:$4 sm:$0xff]   ;;  %v1429_v49 = vld [vmem:[%s1931_s0 + $0xe0] ss:$8 sps:$4 sm:$0xff]   ;;  %v1492_v51 = vld [vmem:[%s1931_s0 + $0x190] ss:$8 sps:$4 sm:$0xff]  }
  0x18   : > { %759 = vmatpush1.bf16.msra.mxu0 %v1399_v9  ;;  %v1430_v50 = vld [vmem:[%s1931_s0 + $0xf4] ss:$8 sps:$4 sm:$0xff]   ;;  %v1496_v52 = vld [vmem:[%s1931_s0 + $0x1a4] ss:$8 sps:$4 sm:$0xff]   ;;  %s1348_s7 = sadd.s32 16, %s1629_s11  ;;  %v376_v55 = vshll.u32 %v1653_v16, 16 }
  0x19   : > { %760 = vmatprep.subr.bf16.mxu0 %v1400_v10  ;;  %554 = vmatpush1.bf16.msra.mxu1 %v1456_v27  ;;  %v1434_v53 = vld [vmem:[%s1931_s0 + $0xf0] ss:$8 sps:$4 sm:$0xff]   ;;  %v1440_v54 = vld [vmem:[%s1931_s0 + $0x204] ss:$8 sps:$4 sm:$0xff]   ;;  %v1498_v56 = vld [vmem:[%s1931_s0 + $0x1a0] ss:$8 sps:$4 sm:$0xff]   ;;  %s247_s24 = scalar_lea.vmem %s1933_s2, %s1348_s7 }
  0x1a   : > { %555 = vmatprep.subr.bf16.mxu1 %v1460_v28  ;;  %v1502_v57 = vld [vmem:[%s1931_s0 + $0x1b4] ss:$8 sps:$4 sm:$0xff]   ;;  %v1438_v58 = vld [vmem:[%s1931_s0 + $0x200] ss:$8 sps:$4 sm:$0xff]   ;;  %v374_v60 = vshrl.u32 %v1653_v16, 16  ;;  %v378_v63 = vrot.slane %v376_v55, 1 }
  0x1b   : > { %v1785_v59 = vld [vmem:[%s1641_s22] ss:$8 sps:$4 sm:$0xff]   ;;  %v1447_v61 = vld [vmem:[%s1931_s0 + $0x214] ss:$8 sps:$4 sm:$0xff]   ;;  %v1504_v62 = vld [vmem:[%s1931_s0 + $0x1b0] ss:$8 sps:$4 sm:$0xff]  }
  0x1c   : > { %761 = vmatpush1.bf16.msra.mxu0 %v1402_v11  ;;  %v263_v0 = vld [vmem:[%s247_s24] sm:$0xff]  ;;  %v834_v3 = vrot.slane %v1653_v16, 1  ;;  %v1445_v4 = vld [vmem:[%s1931_s0 + $0x210] ss:$8 sps:$4 sm:$0xff]   ;;  %v379_v5 = vor.u32 %v378_v63, %v374_v60  ;;  %vm360_vm1 = vsmask.f32 7424 }
  0x1d   : > { %762 = vmatprep.subr.bf16.mxu0 %v1403_v12  ;;  %556 = vmatpush1.bf16.msra.mxu1 %v1462_v31  ;;  %v1508_v1 = vld [vmem:[%s1931_s0 + $0x1c4] ss:$8 sps:$4 sm:$0xff]   ;;  %v1351_v2 = vcombine.high %v263_v0, %v263_v0  ;;  %v1510_v9 = vld [vmem:[%s1931_s0 + $0x1c0] ss:$8 sps:$4 sm:$0xff]   ;;  %v1514_v10 = vld [vmem:[%s1931_s0 + $0x1d4] ss:$8 sps:$4 sm:$0xff]  }
  0x1e   : > { %557 = vmatprep.subr.bf16.mxu1 %v1466_v32  ;;  %v1453_v8 = vld [vmem:[%s1931_s0 + $0x224] ss:$8 sps:$4 sm:$0xff]   ;;  %v1451_v13 = vld [vmem:[%s1931_s0 + $0x220] ss:$8 sps:$4 sm:$0xff]   ;;  %v1459_v15 = vld [vmem:[%s1931_s0 + $0x234] ss:$8 sps:$4 sm:$0xff]  }
  0x1f   : > { %v381_v6 = vshll.u32 %v1351_v2, 16  ;;  %v835_v7 = vrot.slane %v1351_v2, 1  ;;  %v1516_v16 = vld [vmem:[%s1931_s0 + $0x1d0] ss:$8 sps:$4 sm:$0xff]   ;;  %v364_v18 = vshll.u32 %v1785_v59, 16 }
  0x20   : > { %763 = vmatpush1.bf16.msra.mxu0 %v1405_v14  ;;  %v1520_v19 = vld [vmem:[%s1931_s0 + $0x1e4] ss:$8 sps:$4 sm:$0xff]   ;;  %v1522_v23 = vld [vmem:[%s1931_s0 + $0x1e0] ss:$8 sps:$4 sm:$0xff]   ;;  %v1526_v26 = vld [vmem:[%s1931_s0 + $0x1f4] ss:$8 sps:$4 sm:$0xff]  }
  0x21   : > { %764 = vmatprep.subr.bf16.mxu0 %v1406_v17  ;;  %558 = vmatpush1.bf16.msra.mxu1 %v1468_v35  ;;  %v383_v11 = vrot.slane %v381_v6, 1  ;;  %v836_v12 = vsel %vm830_vm0, %v834_v3, %v835_v7  ;;  %v1822_v17 = vcombine.low %v263_v0, %v263_v0  ;;  %v1465_v22 = vld [vmem:[%s1931_s0 + $0x244] ss:$8 sps:$4 sm:$0xff]   ;;  %v1463_v27 = vld [vmem:[%s1931_s0 + $0x240] ss:$8 sps:$4 sm:$0xff]  }
  0x22   : > { %559 = vmatprep.subr.bf16.mxu1 %v1472_v36  ;;  %v1471_v28 = vld [vmem:[%s1931_s0 + $0x254] ss:$8 sps:$4 sm:$0xff]   ;;  %v1469_v32 = vld [vmem:[%s1931_s0 + $0x250] ss:$8 sps:$4 sm:$0xff]   ;;  %v1475_v35 = vld [vmem:[%s1931_s0 + $0x260] ss:$8 sps:$4 sm:$0xff]  }
  0x23   : > { %v384_v14 = vsel %vm360_vm1, %v379_v5, %v383_v11  ;;  %v1483_v36 = vld [vmem:[%s1931_s0 + $0x274] ss:$8 sps:$4 sm:$0xff]   ;;  %v832_v55 = vrot.slane %v1822_v17, 1 }
  0x24   : > { %765 = vmatpush1.bf16.msra.mxu0 %v1408_v20  ;;  %579 = vmatprep.mubr.bf16.mxu1 %v384_v14  ;;  %v1457_v20 = vld [vmem:[%s1931_s0 + $0x230] ss:$8 sps:$4 sm:$0xff]  }
  0x25   : > { %766 = vmatprep.subr.bf16.mxu0 %v1409_v21  ;;  %560 = vmatpush1.bf16.msra.mxu1 %v1474_v39  ;;  %v362_v21 = vshrl.u32 %v1785_v59, 16  ;;  %v1487_v39 = vld [vmem:[%s1931_s0 + $0x280] ss:$8 sps:$4 sm:$0xff]  }
  0x26   : > { %561 = vmatprep.subr.bf16.mxu1 %v1478_v40  ;;  %v1495_v40 = vld [vmem:[%s1931_s0 + $0x294] ss:$8 sps:$4 sm:$0xff]  }
  0x28   : > { %767 = vmatpush1.bf16.msra.mxu0 %v1411_v24  ;;  %v366_v24 = vrot.slane %v364_v18, 1 }
  0x29   : > { %768 = vmatprep.subr.bf16.mxu0 %v1412_v25  ;;  %562 = vmatpush1.bf16.msra.mxu1 %v1480_v43  ;;  %v369_v25 = vshll.u32 %v1822_v17, 16  ;;  %v1499_v43 = vld [vmem:[%s1931_s0 + $0x2a0] ss:$8 sps:$4 sm:$0xff]  }
  0x2a   : > { %563 = vmatprep.subr.bf16.mxu1 %v1484_v44  ;;  %v1507_v44 = vld [vmem:[%s1931_s0 + $0x2b4] ss:$8 sps:$4 sm:$0xff]  }
  0x2b   : > { %v371_v31 = vrot.slane %v369_v25, 1 }
  0x2c   : > { %769 = vmatpush1.bf16.msra.mxu0 %v1414_v29  ;;  %v1528_v29 = vld [vmem:[%s1931_s0 + $0x1f0] ss:$8 sps:$4 sm:$0xff]  }
  0x2d   : > { %770 = vmatprep.subr.bf16.mxu0 %v1415_v30  ;;  %564 = vmatpush1.bf16.msra.mxu1 %v1486_v47  ;;  %v367_v30 = vor.u32 %v366_v24, %v362_v21  ;;  %v1511_v47 = vld [vmem:[%s1931_s0 + $0x2c0] ss:$8 sps:$4 sm:$0xff]  }
  0x2e   : > { %565 = vmatprep.subr.bf16.mxu1 %v1490_v48  ;;  %v1519_v48 = vld [vmem:[%s1931_s0 + $0x2d4] ss:$8 sps:$4 sm:$0xff]  }
  0x30   : > { %771 = vmatpush1.bf16.msra.mxu0 %v1417_v33  ;;  %v1477_v33 = vld [vmem:[%s1931_s0 + $0x264] ss:$8 sps:$4 sm:$0xff]  }
  0x31   : > { %772 = vmatprep.subr.bf16.mxu0 %v1418_v34  ;;  %566 = vmatpush1.bf16.msra.mxu1 %v1492_v51  ;;  %v372_v34 = vsel %vm360_vm1, %v367_v30, %v371_v31  ;;  %v1523_v51 = vld [vmem:[%s1931_s0 + $0x2e0] ss:$8 sps:$4 sm:$0xff]  }
  0x32   : > { %567 = vmatprep.subr.bf16.mxu1 %v1496_v52  ;;  %v1532_v52 = vld [vmem:[%s1931_s0 + $0x2f4] ss:$8 sps:$4 sm:$0xff]  }
  0x34   : > { %773 = vmatpush1.bf16.msra.mxu0 %v1420_v37  ;;  %v1481_v37 = vld [vmem:[%s1931_s0 + $0x270] ss:$8 sps:$4 sm:$0xff]  }
  0x35   : > { %774 = vmatprep.subr.bf16.mxu0 %v1421_v38  ;;  %568 = vmatpush1.bf16.msra.mxu1 %v1498_v56  ;;  %v1489_v38 = vld [vmem:[%s1931_s0 + $0x284] ss:$8 sps:$4 sm:$0xff]  }
  0x36   : > { %569 = vmatprep.subr.bf16.mxu1 %v1502_v57 }
  0x38   : > { %775 = vmatpush1.bf16.msra.mxu0 %v1423_v41  ;;  %v1493_v41 = vld [vmem:[%s1931_s0 + $0x290] ss:$8 sps:$4 sm:$0xff]  }
  0x39   : > { %776 = vmatprep.subr.bf16.mxu0 %v1424_v42  ;;  %570 = vmatpush1.bf16.msra.mxu1 %v1504_v62  ;;  %v1501_v42 = vld [vmem:[%s1931_s0 + $0x2a4] ss:$8 sps:$4 sm:$0xff]  }
  0x3a   : > { %571 = vmatprep.subr.bf16.mxu1 %v1508_v1 }
  0x3c   : > { %777 = vmatpush1.bf16.msra.mxu0 %v1426_v45  ;;  %v1505_v45 = vld [vmem:[%s1931_s0 + $0x2b0] ss:$8 sps:$4 sm:$0xff]  }
  0x3d   : > { %778 = vmatprep.subr.bf16.mxu0 %v1427_v46  ;;  %572 = vmatpush1.bf16.msra.mxu1 %v1510_v9  ;;  %v1513_v46 = vld [vmem:[%s1931_s0 + $0x2c4] ss:$8 sps:$4 sm:$0xff]  }
  0x3e   : > { %573 = vmatprep.subr.bf16.mxu1 %v1514_v10 }
  0x40   : > { %779 = vmatpush1.bf16.msra.mxu0 %v1429_v49  ;;  %v1517_v49 = vld [vmem:[%s1931_s0 + $0x2d0] ss:$8 sps:$4 sm:$0xff]  }
  0x41   : > { %780 = vmatprep.subr.bf16.mxu0 %v1430_v50  ;;  %574 = vmatpush1.bf16.msra.mxu1 %v1516_v16  ;;  %v1525_v50 = vld [vmem:[%s1931_s0 + $0x2e4] ss:$8 sps:$4 sm:$0xff]  }
  0x42   : > { %575 = vmatprep.subr.bf16.mxu1 %v1520_v19 }
  0x44   : > { %781 = vmatpush1.bf16.msra.mxu0 %v1434_v53  ;;  %v1530_v53 = vld [vmem:[%s1931_s0 + $0x2f0] ss:$8 sps:$4 sm:$0xff]  }
  0x45   : > { %999 = vmatprep.subr.bf16.mxu0 %v1440_v54  ;;  %576 = vmatpush1.bf16.msra.mxu1 %v1522_v23  ;;  %v831_v54 = vrot.slane %v1785_v59, 1 }
  0x46   : > { %577 = vmatprep.subr.bf16.mxu1 %v1526_v26 }
  0x47   : > { %783 = vmatmul.mubr.bf16.vlgmr.msra.gmra.mrb[0].mxu0 %v1785_v59  ;;  %v833_v56 = vsel %vm830_vm0, %v831_v54, %v832_v55 }
  0x48   : > { %1000 = vmatpush1.bf16.msra.mxu0 %v1438_v58  ;;  %1031 = vmatprep.mubr.bf16.mxu0 %v836_v12 }
  0x49   : > { %1001 = vmatprep.subr.bf16.mxu0 %v1447_v61  ;;  %578 = vmatpush1.bf16.msra.mxu1 %v1528_v29 }
  0x4c   : > { %1002 = vmatpush1.bf16.msra.mxu0 %v1445_v4  ;;  %580 = vmatmul.mubr.bf16.vlgmr.msra.gmra.mrb[0].mxu1 %v372_v34 }
  0x4d   : > { %1003 = vmatprep.subr.bf16.mxu0 %v1453_v8 }
  0x50   : > { %1004 = vmatpush1.bf16.msra.mxu0 %v1451_v13 }
  0x51   : > { %1005 = vmatprep.subr.bf16.mxu0 %v1459_v15 }
  0x54   : > { %1006 = vmatpush1.bf16.msra.mxu0 %v1457_v20 }
  0x55   : > { %1007 = vmatprep.subr.bf16.mxu0 %v1465_v22 }
  0x58   : > { %1008 = vmatpush1.bf16.msra.mxu0 %v1463_v27 }
  0x59   : > { %1009 = vmatprep.subr.bf16.mxu0 %v1471_v28 }
  0x5c   : > { %1010 = vmatpush1.bf16.msra.mxu0 %v1469_v32 }
  0x5d   : > { %1011 = vmatprep.subr.bf16.mxu0 %v1477_v33 }
  0x60   : > { %1012 = vmatpush1.bf16.msra.mxu0 %v1475_v35 }
  0x61   : > { %1013 = vmatprep.subr.bf16.mxu0 %v1483_v36 }
  0x64   : > { %1014 = vmatpush1.bf16.msra.mxu0 %v1481_v37 }
  0x65   : > { %1015 = vmatprep.subr.bf16.mxu0 %v1489_v38 }
  0x68   : > { %1016 = vmatpush1.bf16.msra.mxu0 %v1487_v39 }
  0x69   : > { %1017 = vmatprep.subr.bf16.mxu0 %v1495_v40 }
  0x6c   : > { %1018 = vmatpush1.bf16.msra.mxu0 %v1493_v41 }
  0x6d   : > { %1019 = vmatprep.subr.bf16.mxu0 %v1501_v42 }
  0x70   : > { %1020 = vmatpush1.bf16.msra.mxu0 %v1499_v43 }
  0x71   : > { %1021 = vmatprep.subr.bf16.mxu0 %v1507_v44 }
  0x74   : > { %1022 = vmatpush1.bf16.msra.mxu0 %v1505_v45 }
  0x75   : > { %1023 = vmatprep.subr.bf16.mxu0 %v1513_v46 }
  0x78   : > { %1024 = vmatpush1.bf16.msra.mxu0 %v1511_v47 }
  0x79   : > { %1025 = vmatprep.subr.bf16.mxu0 %v1519_v48 }
  0x7c   : > { %1026 = vmatpush1.bf16.msra.mxu0 %v1517_v49 }
  0x7d   : > { %1027 = vmatprep.subr.bf16.mxu0 %v1525_v50 }
  0x80   : > { %1028 = vmatpush1.bf16.msra.mxu0 %v1523_v51 }
  0x81   : > { %1029 = vmatprep.subr.bf16.mxu0 %v1532_v52 }
  0x84   : > { %1030 = vmatpush1.bf16.msra.mxu0 %v1530_v53 }
  0x87   : > { %1032 = vmatmul.mubr.bf16.vlgmr.msra.gmra.mrb[0].mxu0 %v833_v56 }
 0x11f   : > { %v581_v57 = vpop.f32.mrb[0].mxu1 }
 0x120   : > { %v583_v58 = vpop.f32.mrb[1].mxu1 }
 0x121   : > { %v585_v60 = vpop.f32.mrb[2].mxu1 }
 0x122   : > { %v587_v61 = vpop.f32.mrb[3].mxu1 }
 0x15a   : > { %v1033_v62 = vpop.f32.mrb[0].mxu0 }
 0x15b   : > { %v1353_v63 = vadd.f32 %v1033_v62, %v581_v57  ;;  %v1035_v0 = vpop.f32.mrb[1].mxu0 }
 0x15c   : > { %v1354_v1 = vadd.f32 %v1035_v0, %v583_v58  ;;  %v1037_v59 = vpop.f32.mrb[2].mxu0 }
 0x15d   : > { %1046 = vst [vmem:[%s259_s9] sm:$0xff] %v1353_v63  ;;  %v1355_v2 = vadd.f32 %v1037_v59, %v585_v60  ;;  %v1039_v3 = vpop.f32.mrb[3].mxu0 }
 0x15e   : > { %1047 = vst [vmem:[%s259_s9 + $0x8] sm:$0xff] %v1354_v1  ;;  %v1356_v4 = vadd.f32 %v1039_v3, %v587_v61 }
 0x15f   : > { %1048 = vst [vmem:[%s259_s9 + $0x10] sm:$0xff] %v1355_v2 }
 0x160   : > { %1049 = vst [vmem:[%s259_s9 + $0x18] sm:$0xff] %v1356_v4 }
 0x161 PF: > { %s13_s14 = sadd.s32 1, %s1556_s14   ;;  %s1935_s12 = smov %s1552_s13 }
 0x162   : > { %p10_p5 = scmp.ge.s32.totalorder %s13_s14, 4   ;;  %s1936_s13 = smov %s1938_s15 }
 0x164   :  { %12 = sbr.rel (!%p10_p5) target bundleno = 2 (0x2), region = 67 }

</bundles_post_ra>
